<compile_context>
chip_gen: v6e
topology: v6e:2x2x1
jax: 0.10.0
libtpu: 0.0.40
codegen_flags: <defaults>
</compile_context>

<pallas_src>
import jax
import jax.numpy as jnp
from jax.experimental import pallas as pl
from jax.experimental.pallas import tpu as pltpu


def _round_up(n, m):
    return ((n + m - 1) // m) * m


def ctc_multihead_kernel(x_ref, wc_ref, bc_ref, o_ref):
    # x_ref : (TM, C)    bf16 rows of the Im2Seq sequence (flattened (B*W, C), lane-dense in C)
    # wc_ref: (C, NCp)   folded encoder.fc @ ctc_head.fc weight (class columns zero-padded)
    # bc_ref: (1, NCp)   folded bias, f32; padded class columns = -1e30 -> softmax weight 0
    # o_ref : (TM, NCp)  softmax probabilities
    logits = jnp.dot(x_ref[...], wc_ref[...],
                     preferred_element_type=jnp.float32) + bc_ref[...]
    m = jnp.max(logits, axis=-1, keepdims=True)
    e = jnp.exp(logits - m)                       # padded columns underflow to exactly 0
    s = jnp.sum(e, axis=-1, keepdims=True)
    o_ref[...] = (e * pl.reciprocal(s, approx=True)).astype(o_ref.dtype)


def multihead_forward(x_nchw, params, *, compute_dtype=jnp.bfloat16,
                      out_dtype=jnp.bfloat16):
    """MultiHead eval forward (CTC branch): softmax probabilities of shape (B, W, n_classes)."""
    B, C, H, W = x_nchw.shape
    assert H == 1, "Im2Seq requires H == 1"

    w1, b1, w2, b2 = params["w1"], params["b1"], params["w2"], params["b2"]
    nc = w2.shape[1]
    nc_p = _round_up(nc, 128)                     # lane-dense class axis

    # ---- Fold the two Linears (no nonlinearity between them), f32, once in the wrapper. ----
    wc = w1.astype(jnp.float32) @ w2.astype(jnp.float32)                       # (C, nc)
    bc = b1.astype(jnp.float32) @ w2.astype(jnp.float32) + b2.astype(jnp.float32)
    wc_p = jnp.zeros((C, nc_p), compute_dtype).at[:, :nc].set(wc.astype(compute_dtype))
    bc_p = jnp.full((1, nc_p), -1e30, jnp.float32).at[:, :nc].set(bc.reshape(1, nc))

    # ---- Im2Seq fold: NCHW (H==1) -> (B, W, C) -> lane-dense (B*W, C); fused with bf16 cast. ----
    total_rows = B * W
    x_rows = (jnp.transpose(x_nchw.reshape(B, C, W), (0, 2, 1))
              .reshape(total_rows, C).astype(compute_dtype))

    # ---- Row tiling: fill the MXU M dim, amortize per-step overhead, keep >=2 parallel steps. ----
    TM_CAP = 256            # keeps f32 logits/exp + output tiles inside v7x's 64 MiB at nc~7k
    tm = min(TM_CAP, _round_up(total_rows, 8))
    if total_rows <= tm and total_rows >= 16:     # ensure >= 2 grid steps for v7x megacore
        tm = _round_up((total_rows + 1) // 2, 8)
    rows_p = _round_up(total_rows, tm)
    if rows_p != total_rows:
        x_rows = jnp.pad(x_rows, ((0, rows_p - total_rows), (0, 0)))
    grid_m = rows_p // tm

    # ---- VMEM plan (always passed: v5e default scope is 16 MiB; cap below v7x's 64 MiB). ----
    in_itm = jnp.dtype(compute_dtype).itemsize
    out_itm = jnp.dtype(out_dtype).itemsize
    vmem_needed = (2 * tm * C * in_itm                      # double-buffered activation tiles
                   + 2 * tm * nc_p * out_itm                # double-buffered output tiles
                   + 2 * (C * nc_p * in_itm + nc_p * 4)     # resident folded weight/bias buffers
                   + 3 * tm * nc_p * 4                      # f32 logits / exp / softmax scratch
                   + (2 << 20))                             # Mosaic internal headroom
    vmem_limit = int(min(max(vmem_needed, 32 << 20), 56 << 20))
    # Further v7x-only option for very large charsets: pipeline_mode=pl.Buffered(1) on the constant
    # weight/bias specs and/or a class-axis grid dimension with a two-pass softmax.

    out_padded = pl.pallas_call(
        ctc_multihead_kernel,
        out_shape=jax.ShapeDtypeStruct((rows_p, nc_p), out_dtype),
        grid_spec=pltpu.PrefetchScalarGridSpec(
            num_scalar_prefetch=0,
            grid=(grid_m,),
            in_specs=[
                pl.BlockSpec((tm, C), lambda i: (i, 0)),      # activation rows, lane-dense in C
                pl.BlockSpec((C, nc_p), lambda i: (0, 0)),    # folded weight (resident in VMEM)
                pl.BlockSpec((1, nc_p), lambda i: (0, 0)),    # folded bias (f32, -1e30 class pad)
            ],
            out_specs=pl.BlockSpec((tm, nc_p), lambda i: (i, 0)),
        ),
        compiler_params=pltpu.CompilerParams(
            dimension_semantics=("parallel",),
            vmem_limit_bytes=vmem_limit,
        ),
    )(x_rows, wc_p, bc_p)

    # Drop padded rows / padded class columns, restore (B, W, n_classes).
    return out_padded[:total_rows, :nc].reshape(B, W, nc)


def init_params(key, in_channels, hidden_size, n_classes, dtype=jnp.float32):
    """Deterministic synthetic init matching nn.Linear shapes:
       encoder.fc: Linear(in_channels, hidden_size); ctc_head.fc: Linear(hidden_size, n_classes)."""
    k1, k2, k3, k4 = jax.random.split(key, 4)
    s1 = 1.0 / (in_channels ** 0.5)
    s2 = 1.0 / (hidden_size ** 0.5)
    return {
        "w1": jax.random.uniform(k1, (in_channels, hidden_size), dtype, -s1, s1),
        "b1": jax.random.uniform(k2, (hidden_size,), dtype, -s1, s1),
        "w2": jax.random.uniform(k3, (hidden_size, n_classes), dtype, -s2, s2),
        "b2": jax.random.uniform(k4, (n_classes,), dtype, -s2, s2),
    }


if __name__ == "__main__":
    # Small shapes consistent with the module: backbone feature map NCHW with H == 1.
    B, C, H, W = 2, 128, 1, 64        # in_channels = 128, sequence length W = 64
    HIDDEN = 48                       # SequenceEncoder(encoder_type='fc', hidden_size=48)
    N_CLASSES = 40                    # out_channels_list['CTCLabelDecode']

    key = jax.random.PRNGKey(0)
    kx, kp = jax.random.split(key)
    x = jax.random.normal(kx, (B, C, H, W), dtype=jnp.float32)
    params = init_params(kp, C, HIDDEN, N_CLASSES)

    fwd = jax.jit(multihead_forward)
    out = jax.block_until_ready(fwd(x, params))
    assert out.shape == (B, W, N_CLASSES)

    # Full-f32 reference of the module's eval forward.
    x_seq = jnp.transpose(x[:, :, 0, :], (0, 2, 1))                      # (B, W, C) Im2Seq
    ref_f32 = jax.nn.softmax(
        (x_seq @ params["w1"] + params["b1"]) @ params["w2"] + params["b2"], axis=-1)

    # Matched-precision reference: same folded bf16 weight / bf16 activations / f32 accumulation
    # as the kernel, but exact division and f32 output.
    wc = params["w1"].astype(jnp.float32) @ params["w2"].astype(jnp.float32)
    bc = params["b1"].astype(jnp.float32) @ params["w2"].astype(jnp.float32) + params["b2"]
    logits_m = jnp.dot(x_seq.astype(jnp.bfloat16), wc.astype(jnp.bfloat16),
                       preferred_element_type=jnp.float32) + bc
    ref_matched = jax.nn.softmax(logits_m, axis=-1)

    outf = out.astype(jnp.float32)
    assert jnp.allclose(outf, ref_matched, atol=1e-2, rtol=0), \
        "mismatch vs matched-precision reference"
    assert jnp.allclose(outf, ref_f32, atol=2e-2, rtol=0), \
        "mismatch vs f32 reference"
    print("KERNEL_OK")
</pallas_src>

<mosaic_0001>
module attributes {stable_mosaic.version = 11 : i64} {
  func.func @ctc_multihead_kernel(%arg0: i32, %arg1: memref<64x128xbf16, #tpu.memory_space<vmem>>, %arg2: memref<128x128xbf16, #tpu.memory_space<vmem>>, %arg3: memref<1x128xf32, #tpu.memory_space<vmem>>, %arg4: memref<64x128xbf16, #tpu.memory_space<vmem>>) attributes {dimension_semantics = [#tpu.dimension_semantics<parallel>], iteration_bounds = array<i64: 2>, scalar_prefetch = 0 : i64, scratch_operands = 0 : i64, tpu.core_type = #tpu.core_type<tc>, window_params = [{transform_indices = @transform_0, window_bounds = array<i64: 64, 128>}, {pipeline_mode = #tpu.pipeline_mode<synchronous>, transform_indices = @transform_1, window_bounds = array<i64: 128, 128>}, {pipeline_mode = #tpu.pipeline_mode<synchronous>, transform_indices = @transform_2, window_bounds = array<i64: 1, 128>}, {transform_indices = @transform_3, window_bounds = array<i64: 64, 128>}]} {
    %c0 = arith.constant 0 : index
    %c0_0 = arith.constant 0 : index
    %0 = vector.load %arg1[%c0, %c0_0] : memref<64x128xbf16, #tpu.memory_space<vmem>>, vector<64x128xbf16>
    %c0_1 = arith.constant 0 : index
    %c0_2 = arith.constant 0 : index
    %1 = vector.load %arg2[%c0_1, %c0_2] : memref<128x128xbf16, #tpu.memory_space<vmem>>, vector<128x128xbf16>
    %cst = arith.constant dense<0.000000e+00> : vector<64x128xf32>
    %2 = tpu.matmul %0, %1, %cst {dimension_numbers = #tpu.dot_dimension_numbers<[1], [0], [0], [1], [0, 0, 1, 1], [], []>} : vector<64x128xbf16>, vector<128x128xbf16>, vector<64x128xf32> -> vector<64x128xf32>
    %c0_3 = arith.constant 0 : index
    %c0_4 = arith.constant 0 : index
    %3 = vector.load %arg3[%c0_3, %c0_4] : memref<1x128xf32, #tpu.memory_space<vmem>>, vector<1x128xf32>
    %4 = vector.broadcast %3 : vector<1x128xf32> to vector<64x128xf32>
    %5 = arith.addf %2, %4 : vector<64x128xf32>
    %cst_5 = arith.constant dense<0xFF800000> : vector<64xf32>
    %6 = vector.multi_reduction <maximumf>, %5, %cst_5 [1] : vector<64x128xf32> to vector<64xf32>
    %7 = vector.shape_cast %6 : vector<64xf32> to vector<64x1xf32>
    %8 = vector.broadcast %7 : vector<64x1xf32> to vector<64x128xf32>
    %9 = arith.subf %5, %8 : vector<64x128xf32>
    %10 = math.exp %9 : vector<64x128xf32>
    %cst_6 = arith.constant dense<0.000000e+00> : vector<64xf32>
    %11 = vector.multi_reduction <add>, %10, %cst_6 [1] : vector<64x128xf32> to vector<64xf32>
    %12 = vector.shape_cast %11 : vector<64xf32> to vector<64x1xf32>
    %13 = tpu.reciprocal %12 {approx = true} : vector<64x1xf32> -> vector<64x1xf32>
    %14 = vector.broadcast %13 : vector<64x1xf32> to vector<64x128xf32>
    %15 = arith.mulf %10, %14 : vector<64x128xf32>
    %16 = arith.truncf %15 : vector<64x128xf32> to vector<64x128xbf16>
    %c0_7 = arith.constant 0 : index
    %c0_8 = arith.constant 0 : index
    %17 = vector.load %arg4[%c0_7, %c0_8] : memref<64x128xbf16, #tpu.memory_space<vmem>>, vector<64x128xbf16>
    tpu.vector_store %arg4[%c0_7, %c0_8], %16 {strides = array<i32>} : memref<64x128xbf16, #tpu.memory_space<vmem>>, vector<64x128xbf16>,
    return
  }
  func.func @transform_0(%arg0: i32) -> (i32, i32) {
    %c0_i32 = arith.constant 0 : i32
    %c0_i32_0 = arith.constant 0 : i32
    return %arg0, %c0_i32 : i32, i32
  }
  func.func @transform_1(%arg0: i32) -> (i32, i32) {
    %c0_i32 = arith.constant 0 : i32
    %c0_i32_0 = arith.constant 0 : i32
    %c0_i32_1 = arith.constant 0 : i32
    return %c0_i32, %c0_i32_0 : i32, i32
  }
  func.func @transform_2(%arg0: i32) -> (i32, i32) {
    %c0_i32 = arith.constant 0 : i32
    %c0_i32_0 = arith.constant 0 : i32
    %c0_i32_1 = arith.constant 0 : i32
    return %c0_i32, %c0_i32_0 : i32, i32
  }
  func.func @transform_3(%arg0: i32) -> (i32, i32) {
    %c0_i32 = arith.constant 0 : i32
    %c0_i32_0 = arith.constant 0 : i32
    return %arg0, %c0_i32 : i32, i32
  }
}

</mosaic_0001>

<bundles_post_ra>
// kernel: multihead_forward.1
= control target key start
LH: loop header
LB: loop body
LE: loop exit
PB: predicated region body
PF: predicated region fallthrough
CT: control target
= control target key end

     0   :  { %s706_s12 = smov 0   ;;  %s763_s0 = inlined_call_operand.vmem [shape: bf16[128,128], index: 0, kind: input, shape index: {}]   ;;  %s764_s1 = inlined_call_operand.vmem [shape: bf16[128,128], index: 1, kind: input, shape index: {}]   ;;  %s765_s2 = inlined_call_operand.vmem [shape: f32[1,128], index: 2, kind: input, shape index: {}]   ;;  %s766_s3 = inlined_call_operand.vmem [shape: bf16[128,128], index: 3, kind: output, shape index: {}]  }
   0x1 LB: > { %s511_s13 = sadd.s32 4294967295, %s684_s12   ;;  %p515_p0 = scmp.ge.s32.totalorder %s684_s12, 1  ;;  %s684_s12 = sphi %s706_s12, %s13_s12  }
   0x2   : > { %p138_p1 = scmp.lt.s32.totalorder %s684_s12, 3 }
   0x4   : > { %p139_p2 = pnand %p515_p0, %p138_p1 }
   0x5   : > { %s516_s16 = sshll.u32 (!%p139_p2), %s511_s13, 3 }
   0x6   : > { %142 = sbr.rel (%p139_p2) target bundleno = 570 (0x23a), region = 32  ;;  %p163_p3 = scmp.lt.s32.totalorder (!%p139_p2), %s516_s16, 15 }
   0xb   : > { %v634_v0 = vld [vmem:[%s764_s1 + $0x38] sm:$0xff]   ;;  %v635_v1 = vld [vmem:[%s764_s1 + $0x30] sm:$0xff]   ;;  %s768_s16 = smov (!%p163_p3, %s516_s16), 15  ;;  %v636_v2 = vld [vmem:[%s764_s1 + $0x28] sm:$0xff]  }
   0xc   : > { %586 = vmatprep.subr.bf16.mxu0 %v634_v0  ;;  %610 = vmatprep.subr.bf16.mxu1 %v634_v0  ;;  %s517_s21 = sshll.u32 %s768_s16, 2  ;;  %v637_v3 = vld [vmem:[%s764_s1 + $0x20] sm:$0xff]   ;;  %v638_v6 = vld [vmem:[%s764_s1 + $0x18] sm:$0xff]   ;;  %v639_v7 = vld [vmem:[%s764_s1 + $0x10] sm:$0xff]  }
   0xd   : > { %587 = vmatpush3.bf16.msra.mxu0 %v634_v0  ;;  %618 = vmatpush3.bf16.msra.mxu1 %v634_v0  ;;  %s731_s24 = scalar_lea.vmem %s763_s0, %s517_s21  ;;  %v640_v8 = vld [vmem:[%s764_s1 + $0x8] sm:$0xff]   ;;  %v641_v9 = vld [vmem:[%s764_s1] sm:$0xff]   ;;  %s172_s13 = scalar_lea.vmem %s766_s3, %s517_s21 }
   0xe   : > { %588 = vmatprep.subr.bf16.mxu0 %v635_v1  ;;  %611 = vmatprep.subr.bf16.mxu1 %v635_v1  ;;  %v642_v4 = vld [vmem:[%s731_s24] sm:$0xff]   ;;  %v643_v5 = vld [vmem:[%s731_s24 + $0x10] sm:$0xff]   ;;  %v644_v10 = vld [vmem:[%s731_s24 + $0x8] sm:$0xff]  }
   0xf   : > { %602 = vmatprep.mubr.bf16.mxu0 %v642_v4  ;;  %606 = vmatprep.mubr.bf16.mxu1 %v643_v5  ;;  %v645_v11 = vld [vmem:[%s731_s24 + $0x18] sm:$0xff]   ;;  %v520_v12 = vld [vmem:[%s765_s2] ss:$0 sm:$0xff] }
  0x11   : > { %589 = vmatpush3.bf16.msra.mxu0 %v635_v1  ;;  %619 = vmatpush3.bf16.msra.mxu1 %v635_v1 }
  0x12   : > { %590 = vmatprep.subr.bf16.mxu0 %v636_v2  ;;  %612 = vmatprep.subr.bf16.mxu1 %v636_v2 }
  0x15   : > { %591 = vmatpush3.bf16.msra.mxu0 %v636_v2  ;;  %620 = vmatpush3.bf16.msra.mxu1 %v636_v2 }
  0x16   : > { %592 = vmatprep.subr.bf16.mxu0 %v637_v3  ;;  %613 = vmatprep.subr.bf16.mxu1 %v637_v3 }
  0x19   : > { %593 = vmatpush3.bf16.msra.mxu0 %v637_v3  ;;  %621 = vmatpush3.bf16.msra.mxu1 %v637_v3 }
  0x1a   : > { %594 = vmatprep.subr.bf16.mxu0 %v638_v6  ;;  %614 = vmatprep.subr.bf16.mxu1 %v638_v6 }
  0x1d   : > { %595 = vmatpush3.bf16.msra.mxu0 %v638_v6  ;;  %622 = vmatpush3.bf16.msra.mxu1 %v638_v6 }
  0x1e   : > { %596 = vmatprep.subr.bf16.mxu0 %v639_v7  ;;  %615 = vmatprep.subr.bf16.mxu1 %v639_v7 }
  0x21   : > { %597 = vmatpush3.bf16.msra.mxu0 %v639_v7  ;;  %623 = vmatpush3.bf16.msra.mxu1 %v639_v7 }
  0x22   : > { %598 = vmatprep.subr.bf16.mxu0 %v640_v8  ;;  %616 = vmatprep.subr.bf16.mxu1 %v640_v8 }
  0x25   : > { %599 = vmatpush3.bf16.msra.mxu0 %v640_v8  ;;  %624 = vmatpush3.bf16.msra.mxu1 %v640_v8 }
  0x26   : > { %600 = vmatprep.subr.bf16.mxu0 %v641_v9  ;;  %617 = vmatprep.subr.bf16.mxu1 %v641_v9 }
  0x29   : > { %601 = vmatpush3.bf16.msra.mxu0 %v641_v9  ;;  %625 = vmatpush3.bf16.msra.mxu1 %v641_v9 }
  0x2c   : > { %603 = vmatmul.mubr.bf16.vlgmr.msra.gmra.mxu0 %v644_v10  ;;  %607 = vmatmul.mubr.bf16.vlgmr.msra.gmra.mxu1 %v645_v11 }
  0xec   : > { %v604_v13 = vpop.f32.mrf.mxu0  ;;  %v608_v14 = vpop.f32.mrf.mxu1 }
  0xed   : > { %v321_v15 = vadd.f32 %v604_v13, %v520_v12  ;;  %v337_v28 = vadd.f32 %v608_v14, %v520_v12 }
  0xee   : > { %v312_v16 = vpop.f32.mrf.mxu0  ;;  %v328_v17 = vpop.f32.mrf.mxu1 }
  0xef   : > { %v313_v18 = vadd.f32 %v520_v12, %v312_v16  ;;  %347 = vmax.xlane.f32.xlu1 %v321_v15  ;;  %v329_v23 = vadd.f32 %v520_v12, %v328_v17 }
  0xf0   : > { %v605_v19 = vpop.f32.mrf.mxu0  ;;  %v609_v20 = vpop.f32.mrf.mxu1 }
  0xf1   : > { %v324_v21 = vadd.f32 %v605_v19, %v520_v12  ;;  %343 = vmax.xlane.f32.xlu0 %v313_v18  ;;  %v340_v27 = vadd.f32 %v609_v20, %v520_v12 }
  0xf2   : > { %v331_v22 = vpop.f32.mrf.mxu1  ;;  %v315_v24 = vpop.f32.mrf.mxu0 }
  0xf3   : > { %349 = vmax.xlane.f32.xlu1 %v324_v21  ;;  %v332_v25 = vadd.f32 %v520_v12, %v331_v22  ;;  %v316_v26 = vadd.f32 %v520_v12, %v315_v24 }
  0xf5   : > { %351 = vmax.xlane.f32.xlu0 %v329_v23 }
  0xf7   : > { %353 = vmax.xlane.f32.xlu1 %v332_v25 }
  0xf9   : > { %345 = vmax.xlane.f32.xlu0 %v316_v26 }
  0xfb   : > { %357 = vmax.xlane.f32.xlu1 %v340_v27 }
  0xfd   : > { %355 = vmax.xlane.f32.xlu0 %v337_v28 }
 0x178   : > { %v348_v29 = vpop.xlane.xlu1 %347 }
 0x179   : > { %v361_v30 = vsub.f32 %v321_v15, %v348_v29 }
 0x17a   : > { %v344_v31 = vpop.xlane.xlu0 %343 }
 0x17b   : > { %v371_v32 = vmul.f32 1.442695, %v361_v30  ;;  %v359_v33 = vsub.f32 %v313_v18, %v344_v31 }
 0x17c   : > { %v350_v34 = vpop.xlane.xlu1 %349 }
 0x17d   : > { %646 = vpow2.f32 %v371_v32  ;;  %v367_v35 = vmul.f32 1.442695, %v359_v33  ;;  %v362_v36 = vsub.f32 %v324_v21, %v350_v34 }
 0x17e   : > { %v352_v37 = vpop.xlane.xlu0 %351 }
 0x17f   : > { %v373_v38 = vmul.f32 1.442695, %v362_v36  ;;  %v363_v39 = vsub.f32 %v329_v23, %v352_v37  ;;  %648 = vpow2.f32 %v367_v35 }
 0x180   : > { %v354_v40 = vpop.xlane.xlu1 %353 }
 0x181   : > { %650 = vpow2.f32 %v373_v38  ;;  %v375_v41 = vmul.f32 1.442695, %v363_v39  ;;  %v364_v42 = vsub.f32 %v332_v25, %v354_v40 }
 0x182   : > { %v346_v43 = vpop.xlane.xlu0 %345 }
 0x183   : > { %v360_v44 = vsub.f32 %v316_v26, %v346_v43  ;;  %652 = vpow2.f32 %v375_v41  ;;  %v377_v47 = vmul.f32 1.442695, %v364_v42 }
 0x184   : > { %v358_v45 = vpop.xlane.xlu1 %357 }
 0x185   : > { %v369_v46 = vmul.f32 1.442695, %v360_v44  ;;  %v366_v49 = vsub.f32 %v340_v27, %v358_v45 }
 0x186   : > { %v356_v48 = vpop.xlane.xlu0 %355 }
 0x187   : > { %654 = vpow2.f32 %v369_v46  ;;  %v365_v50 = vsub.f32 %v337_v28, %v356_v48  ;;  %v381_v53 = vmul.f32 1.442695, %v366_v49 }
 0x188   : > { %656 = vpow2.f32 %v377_v47 }
 0x189   : > { %v379_v51 = vmul.f32 1.442695, %v365_v50 }
 0x18a   : > { %v647_v52 = vpop.eup %646 }
 0x18b   : > { %658 = vpow2.f32 %v379_v51  ;;  %387 = vadd.xlane.f32.xlu0 %v647_v52 }
 0x18c   : > { %v649_v54 = vpop.eup %648  ;;  %660 = vpow2.f32 %v381_v53 }
 0x18e   : > { %v651_v55 = vpop.eup %650 }
 0x18f   : > { %389 = vadd.xlane.f32.xlu1 %v651_v55  ;;  %383 = vadd.xlane.f32.xlu0 %v649_v54 }
 0x190   : > { %v653_v56 = vpop.eup %652 }
 0x193   : > { %391 = vadd.xlane.f32.xlu0 %v653_v56 }
 0x194   : > { %v655_v57 = vpop.eup %654 }
 0x195   : > { %385 = vadd.xlane.f32.xlu1 %v655_v57  ;;  %v657_v58 = vpop.eup %656 }
 0x198   : > { %v659_v59 = vpop.eup %658 }
 0x199   : > { %393 = vadd.xlane.f32.xlu1 %v657_v58  ;;  %395 = vadd.xlane.f32.xlu0 %v659_v59  ;;  %v661_v60 = vpop.eup %660 }
 0x19d   : > { %397 = vadd.xlane.f32.xlu1 %v661_v60 }
 0x214   : > { %v388_v61 = vpop.xlane.xlu0 %387 }
 0x215   : > { %662 = vrcp.f32 %v388_v61 }
 0x218   : > { %v390_v62 = vpop.xlane.xlu1 %389  ;;  %v384_v63 = vpop.xlane.xlu0 %383 }
 0x219   : > { %664 = vrcp.f32 %v390_v62 }
 0x21a   : > { %666 = vrcp.f32 %v384_v63 }
 0x21c   : > { %v392_v0 = vpop.xlane.xlu0 %391 }
 0x21e   : > { %v386_v1 = vpop.xlane.xlu1 %385 }
 0x21f   : > { %668 = vrcp.f32 %v386_v1 }
 0x220   : > { %670 = vrcp.f32 %v392_v0 }
 0x222   : > { %v394_v2 = vpop.xlane.xlu1 %393  ;;  %v396_v3 = vpop.xlane.xlu0 %395 }
 0x223   : > { %672 = vrcp.f32 %v394_v2  ;;  %v663_v4 = vpop.eup %662 }
 0x224   : > { %674 = vrcp.f32 %v396_v3  ;;  %v409_v7 = vmul.f32 %v663_v4, %v647_v52 }
 0x226   : > { %v665_v5 = vpop.eup %664  ;;  %v398_v6 = vpop.xlane.xlu1 %397 }
 0x227   : > { %v410_v8 = vmul.f32 %v665_v5, %v651_v55  ;;  %676 = vrcp.f32 %v398_v6  ;;  %v667_v10 = vpop.eup %666 }
 0x228   : > { %v407_v12 = vmul.f32 %v667_v10, %v649_v54 }
 0x229   : > { %v559_v9 = vpack.c.bf16 %v410_v8, %v409_v7 }
 0x22b   : > { %571 = vst [vmem:[%s172_s13 + $0x8] sm:$0xff] %v559_v9  }
 0x22c   : > { %v669_v11 = vpop.eup %668 }
 0x22d   : > { %v408_v13 = vmul.f32 %v669_v11, %v655_v57  ;;  %v671_v14 = vpop.eup %670 }
 0x22e   : > { %v411_v17 = vmul.f32 %v671_v14, %v653_v56 }
 0x22f   : > { %v554_v15 = vpack.c.bf16 %v408_v13, %v407_v12 }
 0x230   : > { %v673_v16 = vpop.eup %672 }
 0x231   : > { %555 = vst [vmem:[%s172_s13] sm:$0xff] %v554_v15   ;;  %v412_v18 = vmul.f32 %v673_v16, %v657_v58  ;;  %v675_v19 = vpop.eup %674 }
 0x232   : > { %v413_v22 = vmul.f32 %v675_v19, %v659_v59 }
 0x233   : > { %v564_v20 = vpack.c.bf16 %v412_v18, %v411_v17 }
 0x234   : > { %v677_v21 = vpop.eup %676 }
 0x235   : > { %572 = vst [vmem:[%s172_s13 + $0x10] sm:$0xff] %v564_v20   ;;  %v414_v23 = vmul.f32 %v677_v21, %v661_v60 }
 0x237   : > { %v569_v24 = vpack.c.bf16 %v414_v23, %v413_v22 }
 0x239   : > { %573 = vst [vmem:[%s172_s13 + $0x18] sm:$0xff] %v569_v24  }
 0x23a PF: > { %s13_s12 = sadd.s32 1, %s684_s12  }
 0x23b   : > { %p10_p4 = scmp.ge.s32.totalorder %s13_s12, 4  }
 0x23d   :  { %12 = sbr.rel (!%p10_p4) target bundleno = 1 (0x1), region = 62 }

</bundles_post_ra>
